<compile_context>
chip_gen: v6e
topology: v6e:2x2x1
jax: 0.10.0
libtpu: 0.0.40
codegen_flags: <defaults>
</compile_context>

<pallas_src>
import functools

import jax
import jax.numpy as jnp
import numpy as np
from jax.experimental import pallas as pl
from jax.experimental.pallas import tpu as pltpu


def _round_up(x: int, m: int) -> int:
    return ((x + m - 1) // m) * m


def _matmul_epilogue_kernel(a_ref, b_ref, bias_ref, o_ref, acc_ref, *,
                            add_bias: bool, use_relu: bool):
    """acc += A_tile @ B_tile over the trailing k grid axis; bias+ReLU epilogue at last k."""
    k = pl.program_id(2)

    @pl.when(k == 0)
    def _():
        acc_ref[...] = jnp.zeros_like(acc_ref)

    acc_ref[...] += jnp.dot(a_ref[...], b_ref[...],
                            preferred_element_type=jnp.float32)

    @pl.when(k == pl.num_programs(2) - 1)
    def _():
        z = acc_ref[...]
        if add_bias:
            # Keep the epilogue in f32 (v5e VPU has no bf16 path; accumulator is f32 anyway).
            z = z + bias_ref[...].astype(jnp.float32)
        if use_relu:
            z = jnp.maximum(z, 0.0)
        o_ref[...] = z.astype(o_ref.dtype)


def _pallas_matmul(a, b, bias, *, add_bias: bool, use_relu: bool,
                   compute_dtype=jnp.bfloat16, out_dtype=jnp.float32):
    """out = [relu](a @ b [+ bias]) with a tiled TPU grid.

    a: [M, K], b: [K, N], bias: [N]. All dims are zero-padded to tile multiples so
    BlockSpecs satisfy the (8, 128) constraint and the output lane dim is >= 128
    (unmasked, lane-dense stores). Matmul inputs are cast to `compute_dtype`
    (bf16 by default) with f32 accumulation on the MXU.
    """
    M, K = a.shape
    K2, N = b.shape
    assert K == K2, (a.shape, b.shape)

    # Tile sizes: multiples of (8, 128). Caps keep double-buffered input tiles + the f32
    # accumulator well inside scoped VMEM on every generation (v7x: 64 MiB phys / 32 scoped).
    tm = min(256, _round_up(M, 8))
    tn = min(256, _round_up(N, 128))
    tk = min(512, _round_up(K, 128))
    Mp, Kp, Np = _round_up(M, tm), _round_up(K, tk), _round_up(N, tn)

    a_p = jnp.pad(a, ((0, Mp - M), (0, Kp - K))).astype(compute_dtype)
    b_p = jnp.pad(b, ((0, Kp - K), (0, Np - N))).astype(compute_dtype)
    bias_p = jnp.pad(bias.astype(jnp.float32), ((0, Np - N),)).reshape(1, Np)

    grid = (Mp // tm, Np // tn, Kp // tk)
    kernel = functools.partial(_matmul_epilogue_kernel,
                               add_bias=add_bias, use_relu=use_relu)

    in_bytes = jnp.dtype(compute_dtype).itemsize
    cost = pl.CostEstimate(
        flops=2 * Mp * Np * Kp,
        transcendentals=0,
        bytes_accessed=(Mp * Kp + Kp * Np) * in_bytes
        + Mp * Np * jnp.dtype(out_dtype).itemsize,
    )

    out_p = pl.pallas_call(
        kernel,
        out_shape=jax.ShapeDtypeStruct((Mp, Np), out_dtype),
        grid_spec=pltpu.PrefetchScalarGridSpec(
            num_scalar_prefetch=0,
            grid=grid,
            in_specs=[
                pl.BlockSpec((tm, tk), lambda i, j, k: (i, k)),
                pl.BlockSpec((tk, tn), lambda i, j, k: (k, j)),
                pl.BlockSpec((1, tn), lambda i, j, k: (0, j)),
            ],
            out_specs=pl.BlockSpec((tm, tn), lambda i, j, k: (i, j)),
            scratch_shapes=[pltpu.VMEM((tm, tn), jnp.float32)],
        ),
        compiler_params=pltpu.CompilerParams(
            dimension_semantics=("parallel", "parallel", "arbitrary"),
            vmem_limit_bytes=32 * 1024 * 1024,
        ),
        cost_estimate=cost,
    )(a_p, b_p, bias_p)

    return out_p[:M, :N]


def gripnet_external_forward(x, edge_index, weight, bias, num_out_node,
                             edge_weight=None, use_relu=True,
                             compute_dtype=jnp.bfloat16):
    """JAX/Pallas forward reproducing GripNetExternalModule (GCNEncoderLayer inside)."""
    x = x.astype(jnp.float32)
    n_source = x.shape[0]
    src = edge_index[0]
    dst = edge_index[1]
    if edge_weight is None:
        edge_weight = jnp.ones((edge_index.shape[1],), dtype=jnp.float32)
    ew = edge_weight.astype(jnp.float32)

    # GCN normalization on the bipartite graph with remaining self-loops (weight 1):
    #   deg[src r]         = sum_e ew_e over edges out of r  + 1   (its own self-loop)
    #   deg[out node j]    = 1                                     (only its self-loop)
    # norm(r -> j) = deg_src[r]^-1/2 * ew_e * 1; the out-node self-loop hits a zero row.
    # Built directly at [num_out_node, n_source] — no dense n_total^2 adjacency.
    deg_src = jnp.zeros((n_source,), jnp.float32).at[src].add(ew) + 1.0
    dis_src = jnp.where(deg_src > 0, jax.lax.rsqrt(deg_src), 0.0)
    norm = dis_src[src] * ew
    a_sub = jnp.zeros((num_out_node, n_source), jnp.float32).at[dst, src].add(norm)
    # NOTE: restricting columns to source nodes is exact only because the out-node
    # feature rows of x_big are exactly zero (as in the original module).
    # TODO(synk): for very sparse/large graphs a CSR gather kernel (PrefetchScalarGridSpec)
    # would cut HBM bytes vs this dense A_sub matmul.

    # Hot path: Y = X @ W computed once (hoisted out of the row-tiled aggregation),
    # then Out = A_sub @ Y + bias with fused ReLU — two tiled MXU streams.
    y = _pallas_matmul(
        x, weight.astype(jnp.float32), jnp.zeros((weight.shape[1],), jnp.float32),
        add_bias=False, use_relu=False,
        compute_dtype=compute_dtype, out_dtype=jnp.float32)
    out = _pallas_matmul(
        a_sub, y, bias.astype(jnp.float32),
        add_bias=True, use_relu=use_relu,
        compute_dtype=compute_dtype, out_dtype=jnp.float32)
    return out


def _reference_forward(x, edge_index, weight, bias, num_out_node, use_relu=True):
    """Pure-JAX reference of the full (non-restricted) computation for sanity check."""
    n_source = x.shape[0]
    n_total = n_source + num_out_node
    x_big = jnp.concatenate([x, jnp.zeros((num_out_node, x.shape[1]), x.dtype)], axis=0)
    y = x_big @ weight

    row = edge_index[0]
    col = edge_index[1] + n_source
    ew = jnp.ones((edge_index.shape[1],), x.dtype)
    loop = jnp.arange(n_total, dtype=row.dtype)
    row_f = jnp.concatenate([row, loop])
    col_f = jnp.concatenate([col, loop])
    w_f = jnp.concatenate([ew, jnp.ones((n_total,), x.dtype)])
    deg = jnp.zeros((n_total,), x.dtype).at[row_f].add(w_f)
    dis = jnp.where(deg > 0, jax.lax.rsqrt(deg), 0.0)
    norm = dis[row_f] * w_f * dis[col_f]
    out = jnp.zeros((n_total, y.shape[1]), x.dtype).at[col_f].add(norm[:, None] * y[row_f])
    out = out + bias[None, :]
    out = out[n_source:]
    if use_relu:
        out = jnp.maximum(out, 0.0)
    return out


if __name__ == "__main__":
    # Small, module-consistent shapes.
    in_channels = 32      # parent supervertex embedding dim
    out_channels = 16     # supervertex output embedding dim
    num_out_node = 8      # number of output (child) nodes
    n_source = 16         # number of source nodes
    num_edges = 24

    key = jax.random.PRNGKey(0)
    k_x, k_w, k_b, k_src, k_dst = jax.random.split(key, 5)

    x = jax.random.normal(k_x, (n_source, in_channels), dtype=jnp.float32)
    # GCNEncoderLayer parameters: weight [in, out] (glorot-like), bias [out].
    scale = (6.0 / (in_channels + out_channels)) ** 0.5
    weight = jax.random.uniform(
        k_w, (in_channels, out_channels), minval=-scale, maxval=scale, dtype=jnp.float32
    )
    bias = 0.05 * jax.random.normal(k_b, (out_channels,), dtype=jnp.float32)

    # COO edge index: sources in [0, n_source), targets in [0, num_out_node).
    src = jax.random.randint(k_src, (num_edges,), 0, n_source, dtype=jnp.int32)
    dst = jax.random.randint(k_dst, (num_edges,), 0, num_out_node, dtype=jnp.int32)
    edge_index = jnp.stack([src, dst], axis=0)

    ref = _reference_forward(x, edge_index, weight, bias, num_out_node, use_relu=True)

    # f32 compute path: tight structural check.
    out_f32 = gripnet_external_forward(
        x, edge_index, weight, bias, num_out_node,
        edge_weight=None, use_relu=True, compute_dtype=jnp.float32)
    out_f32 = jax.block_until_ready(out_f32)
    np.testing.assert_allclose(np.asarray(out_f32), np.asarray(ref), rtol=1e-4, atol=1e-4)

    # Default bf16-input / f32-accumulate path: looser numeric check.
    out_bf16 = gripnet_external_forward(
        x, edge_index, weight, bias, num_out_node,
        edge_weight=None, use_relu=True, compute_dtype=jnp.bfloat16)
    out_bf16 = jax.block_until_ready(out_bf16)
    np.testing.assert_allclose(np.asarray(out_bf16), np.asarray(ref), rtol=5e-2, atol=5e-2)

    print("KERNEL_OK")
</pallas_src>

<mosaic_0001>
module attributes {stable_mosaic.version = 11 : i64} {
  func.func @_matmul_epilogue_kernel(%arg0: i32, %arg1: i32, %arg2: i32, %arg3: memref<16x128xf32, #tpu.memory_space<vmem>>, %arg4: memref<128x128xf32, #tpu.memory_space<vmem>>, %arg5: memref<1x128xf32, #tpu.memory_space<vmem>>, %arg6: memref<16x128xf32, #tpu.memory_space<vmem>>, %arg7: memref<16x128xf32, #tpu.memory_space<vmem>>) attributes {dimension_semantics = [#tpu.dimension_semantics<parallel>, #tpu.dimension_semantics<parallel>, #tpu.dimension_semantics<arbitrary>], iteration_bounds = array<i64: 1, 1, 1>, scalar_prefetch = 0 : i64, scratch_operands = 1 : i64, tpu.core_type = #tpu.core_type<tc>, window_params = [{transform_indices = @transform_0, window_bounds = array<i64: 16, 128>}, {transform_indices = @transform_1, window_bounds = array<i64: 128, 128>}, {transform_indices = @transform_2, window_bounds = array<i64: 1, 128>}, {transform_indices = @transform_3, window_bounds = array<i64: 16, 128>}]} {
    %c0_i32 = arith.constant 0 : i32
    %0 = arith.cmpi eq, %arg2, %c0_i32 : i32
    %1 = arith.extui %0 : i1 to i32
    %c0_i32_0 = arith.constant 0 : i32
    %2 = arith.cmpi ne, %1, %c0_i32_0 : i32
    scf.if %2 {
      %cst_10 = arith.constant 0.000000e+00 : f32
      %12 = vector.broadcast %cst_10 : f32 to vector<16x128xf32>
      %c0_11 = arith.constant 0 : index
      %c0_12 = arith.constant 0 : index
      %13 = vector.load %arg7[%c0_11, %c0_12] : memref<16x128xf32, #tpu.memory_space<vmem>>, vector<16x128xf32>
      tpu.vector_store %arg7[%c0_11, %c0_12], %12 {strides = array<i32>} : memref<16x128xf32, #tpu.memory_space<vmem>>, vector<16x128xf32>,
    } else {
    }
    %c0 = arith.constant 0 : index
    %c0_1 = arith.constant 0 : index
    %3 = vector.load %arg7[%c0, %c0_1] : memref<16x128xf32, #tpu.memory_space<vmem>>, vector<16x128xf32>
    %c0_2 = arith.constant 0 : index
    %c0_3 = arith.constant 0 : index
    %4 = vector.load %arg3[%c0_2, %c0_3] : memref<16x128xf32, #tpu.memory_space<vmem>>, vector<16x128xf32>
    %c0_4 = arith.constant 0 : index
    %c0_5 = arith.constant 0 : index
    %5 = vector.load %arg4[%c0_4, %c0_5] : memref<128x128xf32, #tpu.memory_space<vmem>>, vector<128x128xf32>
    %cst = arith.constant dense<0.000000e+00> : vector<16x128xf32>
    %6 = tpu.matmul %4, %5, %cst {dimension_numbers = #tpu.dot_dimension_numbers<[1], [0], [0], [1], [0, 0, 1, 1], [], []>} : vector<16x128xf32>, vector<128x128xf32>, vector<16x128xf32> -> vector<16x128xf32>
    %7 = arith.addf %3, %6 : vector<16x128xf32>
    %c0_6 = arith.constant 0 : index
    %c0_7 = arith.constant 0 : index
    %8 = vector.load %arg7[%c0_6, %c0_7] : memref<16x128xf32, #tpu.memory_space<vmem>>, vector<16x128xf32>
    tpu.vector_store %arg7[%c0_6, %c0_7], %7 {strides = array<i32>} : memref<16x128xf32, #tpu.memory_space<vmem>>, vector<16x128xf32>,
    %c0_i32_8 = arith.constant 0 : i32
    %9 = arith.cmpi eq, %arg2, %c0_i32_8 : i32
    %10 = arith.extui %9 : i1 to i32
    %c0_i32_9 = arith.constant 0 : i32
    %11 = arith.cmpi ne, %10, %c0_i32_9 : i32
    scf.if %11 {
      %c0_10 = arith.constant 0 : index
      %c0_11 = arith.constant 0 : index
      %12 = vector.load %arg7[%c0_10, %c0_11] : memref<16x128xf32, #tpu.memory_space<vmem>>, vector<16x128xf32>
      %c0_12 = arith.constant 0 : index
      %c0_13 = arith.constant 0 : index
      %13 = vector.load %arg6[%c0_12, %c0_13] : memref<16x128xf32, #tpu.memory_space<vmem>>, vector<16x128xf32>
      tpu.vector_store %arg6[%c0_12, %c0_13], %12 {strides = array<i32>} : memref<16x128xf32, #tpu.memory_space<vmem>>, vector<16x128xf32>,
    } else {
    }
    return
  }
  func.func @transform_0(%arg0: i32, %arg1: i32, %arg2: i32) -> (i32, i32) {
    %c0_i32 = arith.constant 0 : i32
    return %arg0, %arg2 : i32, i32
  }
  func.func @transform_1(%arg0: i32, %arg1: i32, %arg2: i32) -> (i32, i32) {
    %c0_i32 = arith.constant 0 : i32
    return %arg2, %arg1 : i32, i32
  }
  func.func @transform_2(%arg0: i32, %arg1: i32, %arg2: i32) -> (i32, i32) {
    %c0_i32 = arith.constant 0 : i32
    %c0_i32_0 = arith.constant 0 : i32
    return %c0_i32, %arg1 : i32, i32
  }
  func.func @transform_3(%arg0: i32, %arg1: i32, %arg2: i32) -> (i32, i32) {
    %c0_i32 = arith.constant 0 : i32
    return %arg0, %arg1 : i32, i32
  }
}

</mosaic_0001>

<bundles_post_ra>
// kernel: tpu_custom_call.1
= control target key start
LH: loop header
LB: loop body
LE: loop exit
PB: predicated region body
PF: predicated region fallthrough
CT: control target
= control target key end

     0   :  { %8 = vsyncpa [#allocation4], 0  ;;  %s340_s0 = inlined_call_operand.hbm [shape: f32[16,128], index: 0, kind: input, shape index: {}]   ;;  %s341_s1 = inlined_call_operand.hbm [shape: f32[128,128], index: 1, kind: input, shape index: {}]   ;;  %s342_s2 = inlined_call_operand.vmem [shape: f32[1,128], index: 2, kind: input, shape index: {}]   ;;  %s343_s3 = inlined_call_operand.hbm [shape: f32[16,128], index: 3, kind: output, shape index: {}]  }
   0x1   :  { %9 = vsyncpa [#allocation7], 0 }
   0x2   :  { %10 = vsyncpa [#allocation5], 0  ;;  %s297_s12 = smov [#allocation3]  }
   0x3   :  { %s16_s13 = sshll.u32 %s297_s12, 4  ;;  %s17_s13 = int_to_ptr.vmem [resolvable:$true] %s16_s13 }
   0x4   :  { %s239_s14 = scalar_lea.vmem %s17_s13, 256  ;;  %p244_p1 = scmp.lt.s32.totalorder %s17_s13, %s17_s13 }
   0x5   :  { %p240_p0 = scmp.ne.s32.totalorder %s17_s13, %s239_s14  ;;  %p245_p2 = scmp.lt.s32.totalorder %s239_s14, %s239_s14 }
   0x7   :  { %p246_p3 = por %p245_p2, %p244_p1 }
   0x9   :  { %p247_p4 = pnand %p246_p3, %p240_p0 }
   0xb   :  { %250 = shalt.err (!%p247_p4)
}
   0xc   :  { %s298_s15 = smov 128   ;;  %s299_s16 = smov 8  }
   0xd   :  { %22 = dma.hbm_to_vmem [thread:$0]  %s340_s0, 256, %s17_s13, [#allocation4], %s298_s15, %s298_s15, %s299_s16  }
   0xe   :  { %s300_s18 = smov [#allocation6]  }
   0xf   :  { %s28_s19 = sshll.u32 %s300_s18, 4  ;;  %s29_s19 = int_to_ptr.vmem [resolvable:$true] %s28_s19 }
  0x10   :  { %s259_s20 = scalar_lea.vmem %s29_s19, 2048  ;;  %p264_p6 = scmp.lt.s32.totalorder %s29_s19, %s29_s19 }
  0x11   :  { %p260_p5 = scmp.ne.s32.totalorder %s29_s19, %s259_s20  ;;  %p265_p7 = scmp.lt.s32.totalorder %s259_s20, %s259_s20 }
  0x13   :  { %p266_p8 = por %p265_p7, %p264_p6 }
  0x15   :  { %p267_p9 = pnand %p266_p8, %p260_p5 }
  0x17   :  { %270 = shalt.err (!%p267_p9)
}
  0x18   :  { %34 = dma.hbm_to_vmem [thread:$0]  %s341_s1, 2048, %s29_s19, [#allocation7], %s298_s15, %s298_s15, %s299_s16  }
  0x19   :  { %291 = dma.done.wait [#allocation4], 256  }
  0x1a   :  { %292 = vsyncadd [#allocation4], 4294967040 }
  0x1b   :  { %293 = dma.done.wait [#allocation7], 2048  }
  0x1c   :  { %294 = vsyncadd [#allocation7], 4294965248  ;;  %v68_v0 = vld [vmem:[#allocation6 + $0x78] sm:$0xff]  ;;  %v67_v1 = vld [vmem:[#allocation6 + $0x70] sm:$0xff]  ;;  %s301_s0 = smov [#allocation8]  }
  0x1d   :  { %191 = vmatprep.subr.mxu0 %v68_v0  ;;  %v66_v2 = vld [vmem:[#allocation6 + $0x68] sm:$0xff]  ;;  %v65_v3 = vld [vmem:[#allocation6 + $0x60] sm:$0xff]  ;;  %v51_v4 = vld [vmem:[#allocation3] sm:$0xff]  ;;  %s160_s1 = sshll.u32 %s301_s0, 4  ;;  %s161_s1 = int_to_ptr.vmem [resolvable:$true] %s160_s1 }
  0x1e   :  { %192 = vmatpush3.msra.mxu0 %v68_v0  ;;  %v64_v5 = vld [vmem:[#allocation6 + $0x58] sm:$0xff]  ;;  %223 = vmatprep.mubr.f32.mxu0 %v51_v4  ;;  %v63_v6 = vld [vmem:[#allocation6 + $0x50] sm:$0xff]  ;;  %v62_v7 = vld [vmem:[#allocation6 + $0x48] sm:$0xff]  ;;  %s271_s23 = scalar_lea.vmem %s161_s1, 256  ;;  %p276_p11 = scmp.lt.s32.totalorder %s161_s1, %s161_s1 }
  0x1f   :  { %193 = vmatprep.subr.mxu0 %v67_v1  ;;  %v61_v8 = vld [vmem:[#allocation6 + $0x40] sm:$0xff]  ;;  %v60_v9 = vld [vmem:[#allocation6 + $0x38] sm:$0xff]  ;;  %v59_v10 = vld [vmem:[#allocation6 + $0x30] sm:$0xff]  ;;  %p272_p10 = scmp.ne.s32.totalorder %s161_s1, %s271_s23  ;;  %p277_p12 = scmp.lt.s32.totalorder %s271_s23, %s271_s23 }
  0x20   :  { %194 = vmatpush3.msra.mxu0 %v67_v1  ;;  %v58_v11 = vld [vmem:[#allocation6 + $0x28] sm:$0xff]  ;;  %v57_v12 = vld [vmem:[#allocation6 + $0x20] sm:$0xff]  ;;  %v56_v13 = vld [vmem:[#allocation6 + $0x18] sm:$0xff] }
  0x21   :  { %195 = vmatprep.subr.mxu0 %v66_v2  ;;  %v55_v14 = vld [vmem:[#allocation6 + $0x10] sm:$0xff]  ;;  %v54_v15 = vld [vmem:[#allocation6 + $0x8] sm:$0xff]  ;;  %v53_v16 = vld [vmem:[#allocation6] sm:$0xff]  ;;  %p278_p13 = por %p277_p12, %p276_p11 }
  0x22   :  { %196 = vmatpush3.msra.mxu0 %v66_v2  ;;  %v52_v17 = vld [vmem:[#allocation3 + $0x8] sm:$0xff] }
  0x23   :  { %197 = vmatprep.subr.mxu0 %v65_v3  ;;  %p279_p0 = pnand %p278_p13, %p272_p10 }
  0x24   :  { %198 = vmatpush3.msra.mxu0 %v65_v3 }
  0x25   :  { %199 = vmatprep.subr.mxu0 %v64_v5 }
  0x26   :  { %200 = vmatpush3.msra.mxu0 %v64_v5 }
  0x27   :  { %201 = vmatprep.subr.mxu0 %v63_v6 }
  0x28   :  { %202 = vmatpush3.msra.mxu0 %v63_v6 }
  0x29   :  { %203 = vmatprep.subr.mxu0 %v62_v7 }
  0x2a   :  { %204 = vmatpush3.msra.mxu0 %v62_v7 }
  0x2b   :  { %205 = vmatprep.subr.mxu0 %v61_v8 }
  0x2c   :  { %206 = vmatpush3.msra.mxu0 %v61_v8 }
  0x2d   :  { %207 = vmatprep.subr.mxu0 %v60_v9 }
  0x2e   :  { %208 = vmatpush3.msra.mxu0 %v60_v9 }
  0x2f   :  { %209 = vmatprep.subr.mxu0 %v59_v10 }
  0x30   :  { %210 = vmatpush3.msra.mxu0 %v59_v10 }
  0x31   :  { %211 = vmatprep.subr.mxu0 %v58_v11 }
  0x32   :  { %212 = vmatpush3.msra.mxu0 %v58_v11 }
  0x33   :  { %213 = vmatprep.subr.mxu0 %v57_v12 }
  0x34   :  { %214 = vmatpush3.msra.mxu0 %v57_v12 }
  0x35   :  { %215 = vmatprep.subr.mxu0 %v56_v13 }
  0x36   :  { %216 = vmatpush3.msra.mxu0 %v56_v13 }
  0x37   :  { %217 = vmatprep.subr.mxu0 %v55_v14 }
  0x38   :  { %218 = vmatpush3.msra.mxu0 %v55_v14 }
  0x39   :  { %219 = vmatprep.subr.mxu0 %v54_v15 }
  0x3a   :  { %220 = vmatpush3.msra.mxu0 %v54_v15 }
  0x3b   :  { %221 = vmatprep.subr.mxu0 %v53_v16 }
  0x3c   :  { %222 = vmatpush3.msra.mxu0 %v53_v16 }
  0x3d   :  { %224 = vmatmul.mubr.f32.vlgmr.msra.gmra.mxu0 %v52_v17 }
  0xfd   :  { %v225_v18 = vpop.f32.mrf.mxu0 }
  0xfe   :  { %154 = vst [vmem:[#allocation8 + $0x8] sm:$0xff] %v225_v18 }
  0xff   :  { %v135_v19 = vpop.f32.mrf.mxu0 }
 0x100   :  { %153 = vst [vmem:[#allocation8] sm:$0xff] %v135_v19 }
 0x101   :  { %282 = shalt.err (!%p279_p0)
}
 0x102   :  { %166 = dma.vmem_to_hbm [thread:$0]  %s161_s1, 256, %s343_s3, [#allocation5], %s298_s15, %s298_s15, %s299_s16  }
 0x103   :  { %295 = dma.done.wait [#allocation5], 256  }
 0x104   :  { %296 = vsyncadd [#allocation5], 4294967040 }
 0x105   :  { %170 = vsyncpa [#allocation4], 1 }
 0x106   :  { %171 = vsyncpa [#allocation7], 1 }
 0x107   :  { %172 = vsyncpa [#allocation5], 1 }

</bundles_post_ra>
